<compile_context>
chip_gen: v5e
topology: v5e:2x2
jax: 0.10.0
libtpu: 0.0.40
codegen_flags: <defaults>
</compile_context>

<pallas_src>
import functools
import math

import jax
import jax.numpy as jnp
from jax.experimental import pallas as pl
from jax.experimental.pallas import tpu as pltpu


# ------------------------------- helpers --------------------------------------

def _pick_tile(n, target, align):
    """Largest `align`-multiple divisor of n that is <= target, else n (full dim)."""
    if n <= target:
        return n
    t = (target // align) * align
    while t >= align:
        if n % t == 0:
            return t
        t -= align
    return n


def _layernorm_f32(x, a, b, eps):
    # Annotated-Transformer LayerNorm: unbiased std, eps added outside the sqrt.
    mean = jnp.mean(x, axis=-1, keepdims=True)
    xc = x - mean
    var = jnp.sum(xc * xc, axis=-1, keepdims=True) / (x.shape[-1] - 1)
    return a * xc / (jnp.sqrt(var) + eps) + b


# ----------------------------- Pallas kernels ----------------------------------

def _layernorm_kernel(x_ref, a_ref, b_ref, o_ref, *, eps):
    o_ref[...] = _layernorm_f32(
        x_ref[...].astype(jnp.float32), a_ref[...], b_ref[...], eps
    ).astype(o_ref.dtype)


def _ln_proj_kernel(x_ref, a_ref, b_ref, w_ref, bias_ref, o_ref, *, eps):
    # Fused LayerNorm -> (bf16) projection.
    xn = _layernorm_f32(x_ref[...].astype(jnp.float32), a_ref[...], b_ref[...], eps)
    acc = jnp.dot(xn.astype(jnp.bfloat16), w_ref[...],
                  preferred_element_type=jnp.float32)
    o_ref[...] = (acc + bias_ref[...]).astype(o_ref.dtype)


def _proj_kernel(x_ref, w_ref, bias_ref, o_ref):
    acc = jnp.dot(x_ref[...].astype(jnp.bfloat16), w_ref[...],
                  preferred_element_type=jnp.float32)
    o_ref[...] = (acc + bias_ref[...]).astype(o_ref.dtype)


def _proj_res_kernel(x_ref, w_ref, bias_ref, res_ref, o_ref):
    # Fused output projection + residual add.
    acc = jnp.dot(x_ref[...].astype(jnp.bfloat16), w_ref[...],
                  preferred_element_type=jnp.float32)
    o_ref[...] = (res_ref[...].astype(jnp.float32) + acc + bias_ref[...]).astype(o_ref.dtype)


def _ln_ffn_res_kernel(x_ref, a_ref, b_ref, w1_ref, b1_ref, w2_ref, b2_ref,
                       o_ref, xn_scr, acc_scr, *, eps):
    # Fused LayerNorm -> W1 -> ReLU -> W2 -> + residual, tiled over Dff (axis 1).
    j = pl.program_id(1)

    @pl.when(j == 0)
    def _():
        x = x_ref[...].astype(jnp.float32)
        xn_scr[...] = _layernorm_f32(x, a_ref[...], b_ref[...], eps).astype(jnp.bfloat16)
        acc_scr[...] = x + b2_ref[...]            # residual + final bias

    h = jnp.dot(xn_scr[...], w1_ref[...], preferred_element_type=jnp.float32)
    h = jnp.maximum(h + b1_ref[...], 0.0).astype(jnp.bfloat16)
    acc_scr[...] += jnp.dot(h, w2_ref[...], preferred_element_type=jnp.float32)

    @pl.when(j == pl.num_programs(1) - 1)
    def _():
        o_ref[...] = acc_scr[...].astype(o_ref.dtype)


def _flash_attn_kernel(*refs, scale, causal, has_mask):
    # Flash-style attention over one (batch, head) with online softmax.
    if has_mask:
        mask_ref, q_ref, k_ref, v_ref, o_ref, m_scr, l_scr, acc_scr = refs
    else:
        q_ref, k_ref, v_ref, o_ref, m_scr, l_scr, acc_scr = refs
    j = pl.program_id(3)

    @pl.when(j == 0)
    def _():
        m_scr[...] = jnp.full(m_scr.shape, -jnp.inf, jnp.float32)
        l_scr[...] = jnp.zeros(l_scr.shape, jnp.float32)
        acc_scr[...] = jnp.zeros(acc_scr.shape, jnp.float32)

    q = q_ref[0, 0].astype(jnp.bfloat16)                      # (tq, dk)
    k = k_ref[0, 0].astype(jnp.bfloat16)                      # (tk, dk)
    s = jax.lax.dot_general(q, k, (((1,), (1,)), ((), ())),
                            preferred_element_type=jnp.float32) * scale   # (tq, tk)
    tq, tk = s.shape
    if has_mask:
        s = jnp.where(mask_ref[0] > 0.0, s, -1e9)             # (1, tk) key-padding mask
    if causal:
        rows = pl.program_id(2) * tq + jax.lax.broadcasted_iota(jnp.int32, (tq, tk), 0)
        cols = j * tk + jax.lax.broadcasted_iota(jnp.int32, (tq, tk), 1)
        s = jnp.where(rows >= cols, s, -1e9)

    m_prev = m_scr[...]
    m_new = jnp.maximum(m_prev, jnp.max(s, axis=-1, keepdims=True))
    alpha = jnp.exp(m_prev - m_new)
    p = jnp.exp(s - m_new)
    l_scr[...] = alpha * l_scr[...] + jnp.sum(p, axis=-1, keepdims=True)
    acc_scr[...] = alpha * acc_scr[...] + jnp.dot(
        p.astype(jnp.bfloat16), v_ref[0, 0].astype(jnp.bfloat16),
        preferred_element_type=jnp.float32)
    m_scr[...] = m_new

    @pl.when(j == pl.num_programs(3) - 1)
    def _():
        o_ref[0, 0] = (acc_scr[...] *
                       pl.reciprocal(l_scr[...], approx=True)).astype(o_ref.dtype)


# ----------------------------- kernel wrappers ---------------------------------

def layernorm(x2d, a, b, eps=1e-6, row_target=256):
    R, D = x2d.shape
    rt = _pick_tile(R, row_target, 8)
    return pl.pallas_call(
        functools.partial(_layernorm_kernel, eps=eps),
        out_shape=jax.ShapeDtypeStruct((R, D), jnp.float32),
        grid=(R // rt,),
        in_specs=[pl.BlockSpec((rt, D), lambda i: (i, 0)),
                  pl.BlockSpec((1, D), lambda i: (0, 0)),
                  pl.BlockSpec((1, D), lambda i: (0, 0))],
        out_specs=pl.BlockSpec((rt, D), lambda i: (i, 0)),
        compiler_params=pltpu.CompilerParams(dimension_semantics=("parallel",)),
    )(x2d, a.reshape(1, D), b.reshape(1, D))


def ln_proj(x2d, ln_a, ln_b, w, bias, eps=1e-6, row_target=256):
    R, D = x2d.shape
    Dout = w.shape[1]
    rt = _pick_tile(R, row_target, 8)
    return pl.pallas_call(
        functools.partial(_ln_proj_kernel, eps=eps),
        out_shape=jax.ShapeDtypeStruct((R, Dout), jnp.float32),
        grid=(R // rt,),
        in_specs=[pl.BlockSpec((rt, D), lambda i: (i, 0)),
                  pl.BlockSpec((1, D), lambda i: (0, 0)),
                  pl.BlockSpec((1, D), lambda i: (0, 0)),
                  pl.BlockSpec((D, Dout), lambda i: (0, 0)),
                  pl.BlockSpec((1, Dout), lambda i: (0, 0))],
        out_specs=pl.BlockSpec((rt, Dout), lambda i: (i, 0)),
        compiler_params=pltpu.CompilerParams(dimension_semantics=("parallel",)),
    )(x2d, ln_a.reshape(1, D), ln_b.reshape(1, D), w, bias.reshape(1, Dout))


def proj(x2d, w, bias, row_target=256):
    R, D = x2d.shape
    Dout = w.shape[1]
    rt = _pick_tile(R, row_target, 8)
    return pl.pallas_call(
        _proj_kernel,
        out_shape=jax.ShapeDtypeStruct((R, Dout), jnp.float32),
        grid=(R // rt,),
        in_specs=[pl.BlockSpec((rt, D), lambda i: (i, 0)),
                  pl.BlockSpec((D, Dout), lambda i: (0, 0)),
                  pl.BlockSpec((1, Dout), lambda i: (0, 0))],
        out_specs=pl.BlockSpec((rt, Dout), lambda i: (i, 0)),
        compiler_params=pltpu.CompilerParams(dimension_semantics=("parallel",)),
    )(x2d, w, bias.reshape(1, Dout))


def proj_residual(x2d, w, bias, res2d, row_target=256):
    R, D = x2d.shape
    Dout = w.shape[1]
    rt = _pick_tile(R, row_target, 8)
    return pl.pallas_call(
        _proj_res_kernel,
        out_shape=jax.ShapeDtypeStruct((R, Dout), jnp.float32),
        grid=(R // rt,),
        in_specs=[pl.BlockSpec((rt, D), lambda i: (i, 0)),
                  pl.BlockSpec((D, Dout), lambda i: (0, 0)),
                  pl.BlockSpec((1, Dout), lambda i: (0, 0)),
                  pl.BlockSpec((rt, Dout), lambda i: (i, 0))],
        out_specs=pl.BlockSpec((rt, Dout), lambda i: (i, 0)),
        compiler_params=pltpu.CompilerParams(dimension_semantics=("parallel",)),
    )(x2d, w, bias.reshape(1, Dout), res2d)


def ln_ffn_residual(x2d, ln_a, ln_b, w1, b1, w2, b2,
                    eps=1e-6, row_target=256, ff_target=512):
    R, D = x2d.shape
    Dff = w1.shape[1]
    rt = _pick_tile(R, row_target, 8)
    ft = _pick_tile(Dff, ff_target, 128)
    return pl.pallas_call(
        functools.partial(_ln_ffn_res_kernel, eps=eps),
        out_shape=jax.ShapeDtypeStruct((R, D), jnp.float32),
        grid=(R // rt, Dff // ft),
        in_specs=[pl.BlockSpec((rt, D), lambda i, j: (i, 0)),
                  pl.BlockSpec((1, D), lambda i, j: (0, 0)),
                  pl.BlockSpec((1, D), lambda i, j: (0, 0)),
                  pl.BlockSpec((D, ft), lambda i, j: (0, j)),
                  pl.BlockSpec((1, ft), lambda i, j: (0, j)),
                  pl.BlockSpec((ft, D), lambda i, j: (j, 0)),
                  pl.BlockSpec((1, D), lambda i, j: (0, 0))],
        out_specs=pl.BlockSpec((rt, D), lambda i, j: (i, 0)),
        scratch_shapes=[pltpu.VMEM((rt, D), jnp.bfloat16),
                        pltpu.VMEM((rt, D), jnp.float32)],
        compiler_params=pltpu.CompilerParams(
            dimension_semantics=("parallel", "arbitrary")),
    )(x2d, ln_a.reshape(1, D), ln_b.reshape(1, D),
      w1, b1.reshape(1, Dff), w2, b2.reshape(1, D))


def flash_attention(q, k, v, *, key_mask=None, causal=False,
                    q_target=128, k_target=512):
    # q: (B, H, Tq, dk), k/v: (B, H, Tk, dk), key_mask: (B, 1, Tk) float (1 = keep).
    B, H, Tq, dk = q.shape
    Tk = k.shape[2]
    tq = _pick_tile(Tq, q_target, 8)
    tk = _pick_tile(Tk, k_target, 128)
    scale = 1.0 / math.sqrt(dk)
    has_mask = key_mask is not None

    in_specs, args = [], []
    if has_mask:
        assert key_mask.shape == (B, 1, Tk)
        in_specs.append(pl.BlockSpec((1, 1, tk), lambda b, h, i, j: (b, 0, j)))
        args.append(key_mask.astype(jnp.float32))
    in_specs += [pl.BlockSpec((1, 1, tq, dk), lambda b, h, i, j: (b, h, i, 0)),
                 pl.BlockSpec((1, 1, tk, dk), lambda b, h, i, j: (b, h, j, 0)),
                 pl.BlockSpec((1, 1, tk, dk), lambda b, h, i, j: (b, h, j, 0))]
    args += [q, k, v]

    return pl.pallas_call(
        functools.partial(_flash_attn_kernel, scale=scale, causal=causal,
                          has_mask=has_mask),
        out_shape=jax.ShapeDtypeStruct((B, H, Tq, dk), jnp.float32),
        grid=(B, H, Tq // tq, Tk // tk),
        in_specs=in_specs,
        out_specs=pl.BlockSpec((1, 1, tq, dk), lambda b, h, i, j: (b, h, i, 0)),
        scratch_shapes=[pltpu.VMEM((tq, 1), jnp.float32),
                        pltpu.VMEM((tq, 1), jnp.float32),
                        pltpu.VMEM((tq, dk), jnp.float32)],
        compiler_params=pltpu.CompilerParams(
            dimension_semantics=("parallel", "parallel", "parallel", "arbitrary")),
    )(*args)


# ------------------------------- model glue ------------------------------------

def embed(lut, pe, tokens):
    # TODO(synk): embedding gather + positional-encoding add kept in plain JAX
    # (a data-dependent gather needs scalar-prefetch DMA, out of scope here).
    D = lut.shape[1]
    x = lut[tokens].astype(jnp.float32) * math.sqrt(D)
    return x + pe[: tokens.shape[1]][None, :, :]


def self_attn_sublayer(ln_a, ln_b, ap, x, h, *, causal, key_mask):
    B, T, D = x.shape
    dk = D // h
    x2d = x.reshape(B * T, D)
    qkv = ln_proj(x2d, ln_a, ln_b, ap['wqkv'], ap['bqkv'])        # (B*T, 3D)
    # TODO(synk): host-side head split/merge transposes could be folded into the kernels.
    qkv = qkv.reshape(B, T, 3, h, dk).transpose(2, 0, 3, 1, 4)    # (3, B, h, T, dk)
    o = flash_attention(qkv[0], qkv[1], qkv[2], key_mask=key_mask, causal=causal)
    o2d = o.transpose(0, 2, 1, 3).reshape(B * T, D)
    return proj_residual(o2d, ap['wo'], ap['bo'], x2d).reshape(B, T, D)


def cross_attn_sublayer(ln_a, ln_b, ap, x, memory, h, *, key_mask):
    B, T, D = x.shape
    S = memory.shape[1]
    dk = D // h
    x2d = x.reshape(B * T, D)
    m2d = memory.reshape(B * S, D)
    q = ln_proj(x2d, ln_a, ln_b, ap['wq'], ap['bq'])              # (B*T, D)
    kv = proj(m2d, ap['wkv'], ap['bkv'])                          # (B*S, 2D)
    q4 = q.reshape(B, T, h, dk).transpose(0, 2, 1, 3)
    kv = kv.reshape(B, S, 2, h, dk).transpose(2, 0, 3, 1, 4)      # (2, B, h, S, dk)
    o = flash_attention(q4, kv[0], kv[1], key_mask=key_mask, causal=False)
    o2d = o.transpose(0, 2, 1, 3).reshape(B * T, D)
    return proj_residual(o2d, ap['wo'], ap['bo'], x2d).reshape(B, T, D)


def ffn_sublayer(ln_a, ln_b, fp, x):
    B, T, D = x.shape
    x2d = x.reshape(B * T, D)
    return ln_ffn_residual(x2d, ln_a, ln_b,
                           fp['w1'], fp['b1'], fp['w2'], fp['b2']).reshape(B, T, D)


def layernorm3d(x, a, b):
    B, T, D = x.shape
    return layernorm(x.reshape(B * T, D), a, b).reshape(B, T, D)


def encode(params, src, src_mask, h):
    x = embed(params['src_lut'], params['pe'], src)
    for lp in params['enc_layers']:
        x = self_attn_sublayer(lp['ln0_a'], lp['ln0_b'], lp['attn'], x, h,
                               causal=False, key_mask=src_mask)
        x = ffn_sublayer(lp['ln1_a'], lp['ln1_b'], lp['ffn'], x)
    return layernorm3d(x, params['enc_norm_a'], params['enc_norm_b'])


def decode(params, memory, src_mask, tgt, h, tgt_key_mask=None):
    y = embed(params['tgt_lut'], params['pe'], tgt)
    for lp in params['dec_layers']:
        y = self_attn_sublayer(lp['ln0_a'], lp['ln0_b'], lp['self_attn'], y, h,
                               causal=True, key_mask=tgt_key_mask)
        y = cross_attn_sublayer(lp['ln1_a'], lp['ln1_b'], lp['src_attn'], y, memory, h,
                                key_mask=src_mask)
        y = ffn_sublayer(lp['ln2_a'], lp['ln2_b'], lp['ffn'], y)
    return layernorm3d(y, params['dec_norm_a'], params['dec_norm_b'])


def transformer_forward(params, src, tgt, src_mask, h, tgt_key_mask=None):
    """Transformer.forward: decoder output (generator is not applied in forward)."""
    memory = encode(params, src, src_mask, h)
    return decode(params, memory, src_mask, tgt, h, tgt_key_mask)


# -------------------------- deterministic init ---------------------------------

def init_params(key, *, N, D, Dff, H, V, max_len=512):
    def lin(k, din, dout):
        kw, kb = jax.random.split(k)
        w = (jax.random.normal(kw, (din, dout), jnp.float32) / math.sqrt(din)
             ).astype(jnp.bfloat16)                       # bf16 MXU weights
        b = 0.02 * jax.random.normal(kb, (dout,), jnp.float32)
        return w, b

    def ln_pair():
        return jnp.ones((D,), jnp.float32), jnp.zeros((D,), jnp.float32)

    def enc_layer(k):
        ks = jax.random.split(k, 4)
        wqkv, bqkv = lin(ks[0], D, 3 * D)
        wo, bo = lin(ks[1], D, D)
        w1, b1 = lin(ks[2], D, Dff)
        w2, b2 = lin(ks[3], Dff, D)
        a0, b0_ = ln_pair(); a1, b1_ = ln_pair()
        return dict(ln0_a=a0, ln0_b=b0_,
                    attn=dict(wqkv=wqkv, bqkv=bqkv, wo=wo, bo=bo),
                    ln1_a=a1, ln1_b=b1_,
                    ffn=dict(w1=w1, b1=b1, w2=w2, b2=b2))

    def dec_layer(k):
        ks = jax.random.split(k, 7)
        wqkv, bqkv = lin(ks[0], D, 3 * D)
        wo0, bo0 = lin(ks[1], D, D)
        wq, bq = lin(ks[2], D, D)
        wkv, bkv = lin(ks[3], D, 2 * D)
        wo1, bo1 = lin(ks[4], D, D)
        w1, b1 = lin(ks[5], D, Dff)
        w2, b2 = lin(ks[6], Dff, D)
        a0, b0_ = ln_pair(); a1, b1_ = ln_pair(); a2, b2_ = ln_pair()
        return dict(ln0_a=a0, ln0_b=b0_,
                    self_attn=dict(wqkv=wqkv, bqkv=bqkv, wo=wo0, bo=bo0),
                    ln1_a=a1, ln1_b=b1_,
                    src_attn=dict(wq=wq, bq=bq, wkv=wkv, bkv=bkv, wo=wo1, bo=bo1),
                    ln2_a=a2, ln2_b=b2_,
                    ffn=dict(w1=w1, b1=b1, w2=w2, b2=b2))

    keys = jax.random.split(key, 2 * N + 2)
    enc_layers = [enc_layer(keys[i]) for i in range(N)]
    dec_layers = [dec_layer(keys[N + i]) for i in range(N)]
    src_lut = jax.random.normal(keys[2 * N], (V, D), jnp.float32)
    tgt_lut = jax.random.normal(keys[2 * N + 1], (V, D), jnp.float32)

    pos = jnp.arange(max_len, dtype=jnp.float32)[:, None]
    div = jnp.exp(jnp.arange(0, D, 2, dtype=jnp.float32) * (-math.log(10000.0) / D))
    pe = jnp.zeros((max_len, D), jnp.float32)
    pe = pe.at[:, 0::2].set(jnp.sin(pos * div))
    pe = pe.at[:, 1::2].set(jnp.cos(pos * div))

    na, nb = jnp.ones((D,), jnp.float32), jnp.zeros((D,), jnp.float32)
    return dict(enc_layers=enc_layers, dec_layers=dec_layers,
                enc_norm_a=na, enc_norm_b=nb,
                dec_norm_a=na, dec_norm_b=nb,
                src_lut=src_lut, tgt_lut=tgt_lut, pe=pe)


# --------------------------- pure-JAX reference ---------------------------------

def _ref_ln(x, a, b, eps=1e-6):
    mean = x.mean(-1, keepdims=True)
    xc = x - mean
    var = jnp.sum(xc * xc, -1, keepdims=True) / (x.shape[-1] - 1)
    return a * xc / (jnp.sqrt(var) + eps) + b


def _ref_attention(q, k, v, h, mask):
    B, Tq, D = q.shape
    Tk = k.shape[1]
    dk = D // h
    qh = q.reshape(B, Tq, h, dk).transpose(0, 2, 1, 3)
    kh = k.reshape(B, Tk, h, dk).transpose(0, 2, 1, 3)
    vh = v.reshape(B, Tk, h, dk).transpose(0, 2, 1, 3)
    s = jnp.einsum('bhqd,bhkd->bhqk', qh, kh) / math.sqrt(dk)
    if mask is not None:
        s = jnp.where(mask[:, None] > 0, s, -1e9)
    p = jax.nn.softmax(s, -1)
    o = jnp.einsum('bhqk,bhkd->bhqd', p, vh)
    return o.transpose(0, 2, 1, 3).reshape(B, Tq, D)


def _ref_self_attn(ln_a, ln_b, ap, x, h, mask):
    D = x.shape[-1]
    xn = _ref_ln(x, ln_a, ln_b)
    qkv = xn @ ap['wqkv'].astype(jnp.float32) + ap['bqkv']
    q, k, v = qkv[..., :D], qkv[..., D:2 * D], qkv[..., 2 * D:]
    o = _ref_attention(q, k, v, h, mask)
    return x + o @ ap['wo'].astype(jnp.float32) + ap['bo']


def _ref_cross_attn(ln_a, ln_b, ap, x, memory, h, mask):
    D = x.shape[-1]
    xn = _ref_ln(x, ln_a, ln_b)
    q = xn @ ap['wq'].astype(jnp.float32) + ap['bq']
    kv = memory @ ap['wkv'].astype(jnp.float32) + ap['bkv']
    k, v = kv[..., :D], kv[..., D:]
    o = _ref_attention(q, k, v, h, mask)
    return x + o @ ap['wo'].astype(jnp.float32) + ap['bo']


def _ref_ffn(ln_a, ln_b, fp, x):
    xn = _ref_ln(x, ln_a, ln_b)
    hdn = jnp.maximum(xn @ fp['w1'].astype(jnp.float32) + fp['b1'], 0.0)
    return x + hdn @ fp['w2'].astype(jnp.float32) + fp['b2']


def ref_forward(params, src, tgt, src_mask, h):
    x = embed(params['src_lut'], params['pe'], src)
    for lp in params['enc_layers']:
        x = _ref_self_attn(lp['ln0_a'], lp['ln0_b'], lp['attn'], x, h, src_mask)
        x = _ref_ffn(lp['ln1_a'], lp['ln1_b'], lp['ffn'], x)
    memory = _ref_ln(x, params['enc_norm_a'], params['enc_norm_b'])

    T = tgt.shape[1]
    causal = jnp.tril(jnp.ones((1, T, T), jnp.float32))
    y = embed(params['tgt_lut'], params['pe'], tgt)
    for lp in params['dec_layers']:
        y = _ref_self_attn(lp['ln0_a'], lp['ln0_b'], lp['self_attn'], y, h, causal)
        y = _ref_cross_attn(lp['ln1_a'], lp['ln1_b'], lp['src_attn'], y, memory, h, src_mask)
        y = _ref_ffn(lp['ln2_a'], lp['ln2_b'], lp['ffn'], y)
    return _ref_ln(y, params['dec_norm_a'], params['dec_norm_b'])


# ------------------------------------ main --------------------------------------

if __name__ == "__main__":
    B, S, T, D, H, Dff, N, V = 2, 16, 16, 128, 4, 256, 2, 64
    key = jax.random.PRNGKey(0)
    kp, ks, kt = jax.random.split(key, 3)

    params = init_params(kp, N=N, D=D, Dff=Dff, H=H, V=V)
    src = jax.random.randint(ks, (B, S), 0, V, dtype=jnp.int32)
    tgt = jax.random.randint(kt, (B, T), 0, V, dtype=jnp.int32)
    # Key-padding mask for the source (batch 1 has 4 padded positions).
    src_lens = jnp.array([S, S - 4], jnp.int32)
    src_mask = (jnp.arange(S)[None, :] < src_lens[:, None]).astype(jnp.float32)
    src_mask = src_mask.reshape(B, 1, S)
    # tgt_mask: pure causal (generated in-kernel via broadcasted_iota).

    out = transformer_forward(params, src, tgt, src_mask, h=H, tgt_key_mask=None)
    out = jax.block_until_ready(out)

    ref = ref_forward(params, src, tgt, src_mask, h=H)
    assert out.shape == (B, T, D)
    err = float(jnp.max(jnp.abs(out - ref)))
    # bf16-MXU kernel path vs f32 reference (shared bf16 weights): loose-ish tolerance.
    assert err < 3e-2, f"mismatch vs pure-JAX reference: {err}"

    print("KERNEL_OK")
</pallas_src>

<mosaic_0001>
module attributes {stable_mosaic.version = 11 : i64} {
  func.func @_ln_proj_kernel(%arg0: i32, %arg1: memref<32x128xf32, #tpu.memory_space<vmem>>, %arg2: memref<1x128xf32, #tpu.memory_space<vmem>>, %arg3: memref<1x128xf32, #tpu.memory_space<vmem>>, %arg4: memref<128x384xbf16, #tpu.memory_space<vmem>>, %arg5: memref<1x384xf32, #tpu.memory_space<vmem>>, %arg6: memref<32x384xf32, #tpu.memory_space<vmem>>) attributes {dimension_semantics = [#tpu.dimension_semantics<parallel>], iteration_bounds = array<i64: 1>, scalar_prefetch = 0 : i64, scratch_operands = 0 : i64, tpu.core_type = #tpu.core_type<tc>, window_params = [{transform_indices = @transform_0, window_bounds = array<i64: 32, 128>}, {pipeline_mode = #tpu.pipeline_mode<synchronous>, transform_indices = @transform_1, window_bounds = array<i64: 1, 128>}, {pipeline_mode = #tpu.pipeline_mode<synchronous>, transform_indices = @transform_2, window_bounds = array<i64: 1, 128>}, {pipeline_mode = #tpu.pipeline_mode<synchronous>, transform_indices = @transform_3, window_bounds = array<i64: 128, 384>}, {pipeline_mode = #tpu.pipeline_mode<synchronous>, transform_indices = @transform_4, window_bounds = array<i64: 1, 384>}, {transform_indices = @transform_5, window_bounds = array<i64: 32, 384>}]} {
    %c0 = arith.constant 0 : index
    %c0_0 = arith.constant 0 : index
    %0 = vector.load %arg1[%c0, %c0_0] : memref<32x128xf32, #tpu.memory_space<vmem>>, vector<32x128xf32>
    %c0_1 = arith.constant 0 : index
    %c0_2 = arith.constant 0 : index
    %1 = vector.load %arg2[%c0_1, %c0_2] : memref<1x128xf32, #tpu.memory_space<vmem>>, vector<1x128xf32>
    %c0_3 = arith.constant 0 : index
    %c0_4 = arith.constant 0 : index
    %2 = vector.load %arg3[%c0_3, %c0_4] : memref<1x128xf32, #tpu.memory_space<vmem>>, vector<1x128xf32>
    %cst = arith.constant dense<0.000000e+00> : vector<32xf32>
    %3 = vector.multi_reduction <add>, %0, %cst [1] : vector<32x128xf32> to vector<32xf32>
    %4 = vector.shape_cast %3 : vector<32xf32> to vector<32x1xf32>
    %cst_5 = arith.constant 1.280000e+02 : f32
    %5 = vector.broadcast %cst_5 : f32 to vector<32x1xf32>
    %6 = arith.divf %4, %5 : vector<32x1xf32>
    %7 = vector.broadcast %6 : vector<32x1xf32> to vector<32x128xf32>
    %8 = arith.subf %0, %7 : vector<32x128xf32>
    %9 = arith.mulf %8, %8 : vector<32x128xf32>
    %cst_6 = arith.constant dense<0.000000e+00> : vector<32xf32>
    %10 = vector.multi_reduction <add>, %9, %cst_6 [1] : vector<32x128xf32> to vector<32xf32>
    %11 = vector.shape_cast %10 : vector<32xf32> to vector<32x1xf32>
    %cst_7 = arith.constant 1.270000e+02 : f32
    %12 = vector.broadcast %cst_7 : f32 to vector<32x1xf32>
    %13 = arith.divf %11, %12 : vector<32x1xf32>
    %14 = vector.broadcast %1 : vector<1x128xf32> to vector<32x128xf32>
    %15 = arith.mulf %14, %8 : vector<32x128xf32>
    %16 = math.sqrt %13 : vector<32x1xf32>
    %cst_8 = arith.constant 9.99999997E-7 : f32
    %17 = vector.broadcast %cst_8 : f32 to vector<32x1xf32>
    %18 = arith.addf %16, %17 : vector<32x1xf32>
    %19 = vector.broadcast %18 : vector<32x1xf32> to vector<32x128xf32>
    %20 = arith.divf %15, %19 : vector<32x128xf32>
    %21 = vector.broadcast %2 : vector<1x128xf32> to vector<32x128xf32>
    %22 = arith.addf %20, %21 : vector<32x128xf32>
    %23 = arith.truncf %22 : vector<32x128xf32> to vector<32x128xbf16>
    %c0_9 = arith.constant 0 : index
    %c0_10 = arith.constant 0 : index
    %24 = vector.load %arg4[%c0_9, %c0_10] : memref<128x384xbf16, #tpu.memory_space<vmem>>, vector<128x384xbf16>
    %cst_11 = arith.constant dense<0.000000e+00> : vector<32x384xf32>
    %25 = tpu.matmul %23, %24, %cst_11 {dimension_numbers = #tpu.dot_dimension_numbers<[1], [0], [0], [1], [0, 0, 1, 1], [], []>} : vector<32x128xbf16>, vector<128x384xbf16>, vector<32x384xf32> -> vector<32x384xf32>
    %c0_12 = arith.constant 0 : index
    %c0_13 = arith.constant 0 : index
    %26 = vector.load %arg5[%c0_12, %c0_13] : memref<1x384xf32, #tpu.memory_space<vmem>>, vector<1x384xf32>
    %27 = vector.broadcast %26 : vector<1x384xf32> to vector<32x384xf32>
    %28 = arith.addf %25, %27 : vector<32x384xf32>
    %c0_14 = arith.constant 0 : index
    %c0_15 = arith.constant 0 : index
    %29 = vector.load %arg6[%c0_14, %c0_15] : memref<32x384xf32, #tpu.memory_space<vmem>>, vector<32x384xf32>
    tpu.vector_store %arg6[%c0_14, %c0_15], %28 {strides = array<i32>} : memref<32x384xf32, #tpu.memory_space<vmem>>, vector<32x384xf32>,
    return
  }
  func.func @transform_0(%arg0: i32) -> (i32, i32) {
    %c0_i32 = arith.constant 0 : i32
    %c0_i32_0 = arith.constant 0 : i32
    return %arg0, %c0_i32 : i32, i32
  }
  func.func @transform_1(%arg0: i32) -> (i32, i32) {
    %c0_i32 = arith.constant 0 : i32
    %c0_i32_0 = arith.constant 0 : i32
    %c0_i32_1 = arith.constant 0 : i32
    return %c0_i32, %c0_i32_0 : i32, i32
  }
  func.func @transform_2(%arg0: i32) -> (i32, i32) {
    %c0_i32 = arith.constant 0 : i32
    %c0_i32_0 = arith.constant 0 : i32
    %c0_i32_1 = arith.constant 0 : i32
    return %c0_i32, %c0_i32_0 : i32, i32
  }
  func.func @transform_3(%arg0: i32) -> (i32, i32) {
    %c0_i32 = arith.constant 0 : i32
    %c0_i32_0 = arith.constant 0 : i32
    %c0_i32_1 = arith.constant 0 : i32
    return %c0_i32, %c0_i32_0 : i32, i32
  }
  func.func @transform_4(%arg0: i32) -> (i32, i32) {
    %c0_i32 = arith.constant 0 : i32
    %c0_i32_0 = arith.constant 0 : i32
    %c0_i32_1 = arith.constant 0 : i32
    return %c0_i32, %c0_i32_0 : i32, i32
  }
  func.func @transform_5(%arg0: i32) -> (i32, i32) {
    %c0_i32 = arith.constant 0 : i32
    %c0_i32_0 = arith.constant 0 : i32
    return %arg0, %c0_i32 : i32, i32
  }
}

</mosaic_0001>

<bundles_post_ra>
// kernel: tpu_custom_call.1
= control target key start
LH: loop header
LB: loop body
LE: loop exit
PB: predicated region body
PF: predicated region fallthrough
CT: control target
= control target key end

     0   :  { %10 = vsyncpa [#allocation3], 0  ;;  %s956_s0 = inlined_call_operand.hbm [shape: f32[32,128], index: 0, kind: input, shape index: {}]   ;;  %s957_s1 = inlined_call_operand.hbm [shape: f32[1,128], index: 1, kind: input, shape index: {}]   ;;  %s958_s2 = inlined_call_operand.hbm [shape: f32[1,128], index: 2, kind: input, shape index: {}]   ;;  %s959_s3 = inlined_call_operand.hbm [shape: bf16[128,384], index: 3, kind: input, shape index: {}]   ;;  %s960_s4 = inlined_call_operand.vmem [shape: f32[1,384], index: 4, kind: input, shape index: {}]   ;;  %s961_s5 = inlined_call_operand.hbm [shape: f32[32,384], index: 5, kind: output, shape index: {}]  }
   0x1   :  { %11 = vsyncpa [#allocation6], 0 }
   0x2   :  { %12 = vsyncpa [#allocation9], 0  ;;  %s32_s20 = sshll.u32 %s957_s1, 4  ;;  %s33_s20 = int_to_ptr.hbm [resolvable:$true] %s32_s20 }
   0x3   :  { %13 = vsyncpa [#allocation4], 0  ;;  %s809_s21 = smov [#allocation5]   ;;  %s18_s25 = sshll.u32 %s956_s0, 4  ;;  %s19_s25 = int_to_ptr.hbm [resolvable:$true] %s18_s25 }
   0x4   :  { %s34_s22 = sshll.u32 %s809_s21, 4  ;;  %s810_s26 = smov [#allocation2]   ;;  %s35_s22 = int_to_ptr.vmem [resolvable:$true] %s34_s22 }
   0x5   :  { %37 = dma.hbm_to_vmem [thread:$0]  %s33_s20, 16, %s35_s22, [#allocation6]  }
   0x6   :  { %s20_s27 = sshll.u32 %s810_s26, 4  ;;  %s811_s28 = smov 128   ;;  %s21_s27 = int_to_ptr.vmem [resolvable:$true] %s20_s27 }
   0x7   :  { %s812_s29 = smov 8   ;;  %s43_s1 = sshll.u32 %s958_s2, 4  ;;  %s44_s1 = int_to_ptr.hbm [resolvable:$true] %s43_s1 }
   0x8   :  { %26 = dma.hbm_to_vmem [thread:$0]  %s19_s25, 512, %s21_s27, [#allocation3], %s811_s28, %s811_s28, %s812_s29  }
   0x9   :  { %s813_s7 = smov [#allocation7]   ;;  %s53_s0 = sshll.u32 %s959_s3, 4  ;;  %s54_s0 = int_to_ptr.hbm [resolvable:$true] %s53_s0 }
   0xa   :  { %s45_s8 = sshll.u32 %s813_s7, 4  ;;  %s814_s11 = smov [#allocation8]   ;;  %s46_s8 = int_to_ptr.vmem [resolvable:$true] %s45_s8 }
   0xb   :  { %48 = dma.hbm_to_vmem [thread:$0]  %s44_s1, 16, %s46_s8, [#allocation6]  }
   0xc   :  { %s55_s12 = sshll.u32 %s814_s11, 4  ;;  %s815_s13 = smov 192   ;;  %s56_s12 = int_to_ptr.vmem [resolvable:$true] %s55_s12 }
   0xd   :  { %s816_s14 = smov 12  }
   0xe   :  { %61 = dma.hbm_to_vmem [thread:$0]  %s54_s0, 3072, %s56_s12, [#allocation9], %s815_s13, %s815_s13, %s816_s14  }
   0xf   :  { %801 = dma.done.wait [#allocation3], 512  }
  0x10   :  { %802 = vsyncadd [#allocation3], 4294966784 }
  0x11   :  { %803 = dma.done.wait [#allocation6], 32  }
  0x12   :  { %804 = vsyncadd [#allocation6], 4294967264 }
  0x13   :  { %805 = dma.done.wait [#allocation9], 3072  }
  0x14   :  { %806 = vsyncadd [#allocation9], 4294964224  ;;  %v82_v0 = vld [vmem:[#allocation2 + $0x10] sm:$0xff]  ;;  %v80_v1 = vld [vmem:[#allocation2] sm:$0xff]  ;;  %v817_v4 = vmov 128.0   ;;  %v818_v27 = vmov 127.0  }
  0x15   :  { %90 = vadd.xlane.f32.xlu1 %v82_v0  ;;  %86 = vadd.xlane.f32.xlu0 %v80_v1  ;;  %v83_v2 = vld [vmem:[#allocation2 + $0x18] sm:$0xff]  ;;  %v81_v3 = vld [vmem:[#allocation2 + $0x8] sm:$0xff]  ;;  %661 = vrcp.f32 %v817_v4  ;;  %v635_v34 = vld [vmem:[#allocation8 + $0xac] sm:$0xf]  ;;  %s503_s18 = sshll.u32 %s961_s5, 4  ;;  %s820_s19 = smov 384   ;;  %s504_s18 = int_to_ptr.hbm [resolvable:$true] %s503_s18 }
  0x16   :  { %663 = vrcp.f32 %v818_v27  ;;  %v604_v32 = vld [vmem:[#allocation8 + $0xa8] sm:$0xf]  ;;  %v636_v33 = vld [vmem:[#allocation8 + $0xb0] sm:$0xf0]  ;;  %v606_v37 = vld [vmem:[#allocation8 + $0xb4] sm:$0xf0] }
  0x17   :  { %v605_v36 = vor.u32 %v636_v33, %v604_v32  ;;  %v612_v38 = vld [vmem:[#allocation8 + $0xb0] sm:$0xf]  ;;  %v637_v39 = vld [vmem:[#allocation8 + $0xb8] sm:$0xf0]  ;;  %v609_v40 = vor.u32 %v635_v34, %v606_v37  ;;  %v632_v44 = vld [vmem:[#allocation8 + $0x94] sm:$0xf] }
  0x18   :  { %v613_v41 = vor.u32 %v637_v39, %v612_v38  ;;  %v592_v42 = vld [vmem:[#allocation8 + $0x90] sm:$0xf]  ;;  %v633_v43 = vld [vmem:[#allocation8 + $0x98] sm:$0xf0]  ;;  %v594_v47 = vld [vmem:[#allocation8 + $0x9c] sm:$0xf0] }
  0x19   :  { %428 = vmatpush.bf16.msra.mxu0 %v605_v36  ;;  %638 = vmatpush.bf16.msra.mxu3 %v605_v36  ;;  %v593_v46 = vor.u32 %v633_v43, %v592_v42  ;;  %v600_v48 = vld [vmem:[#allocation8 + $0x98] sm:$0xf]  ;;  %v634_v49 = vld [vmem:[#allocation8 + $0xa0] sm:$0xf0]  ;;  %v597_v50 = vor.u32 %v632_v44, %v594_v47  ;;  %v629_v54 = vld [vmem:[#allocation8 + $0x7c] sm:$0xf] }
  0x1a   :  { %447 = vmatpush.bf16.msra.mxu1 %v609_v40  ;;  %466 = vmatpush.bf16.msra.mxu2 %v613_v41  ;;  %v601_v51 = vor.u32 %v634_v49, %v600_v48  ;;  %v580_v52 = vld [vmem:[#allocation8 + $0x78] sm:$0xf]  ;;  %v630_v53 = vld [vmem:[#allocation8 + $0x80] sm:$0xf0]  ;;  %v582_v58 = vld [vmem:[#allocation8 + $0x84] sm:$0xf0] }
  0x1b   :  { %v662_v5 = vpop.eup %661  ;;  %v581_v57 = vor.u32 %v630_v53, %v580_v52  ;;  %v588_v59 = vld [vmem:[#allocation8 + $0x80] sm:$0xf]  ;;  %v631_v60 = vld [vmem:[#allocation8 + $0x88] sm:$0xf0]  ;;  %v585_v63 = vor.u32 %v629_v54, %v582_v58  ;;  %v570_v4 = vld [vmem:[#allocation8 + $0x6c] sm:$0xf0] }
  0x1c   :  { %v95_v6 = vmul.f32 128.0, %v662_v5  ;;  %vm99_vm0 = vweird.f32 %v662_v5  ;;  %v664_v28 = vpop.eup %663  ;;  %v546_v33 = vld [vmem:[#allocation8 + $0x3c] sm:$0xf0]  ;;  %v552_v34 = vld [vmem:[#allocation8 + $0x38] sm:$0xf]  ;;  %s821_s20 = smov 24  }
  0x1d   :  { %92 = vadd.xlane.f32.xlu1 %v83_v2  ;;  %88 = vadd.xlane.f32.xlu0 %v81_v3  ;;  %v122_v29 = vmul.f32 127.0, %v664_v28  ;;  %vm126_vm1 = vweird.f32 %v664_v28  ;;  %v532_v39 = vld [vmem:[#allocation8 + $0x18] sm:$0xf]  ;;  %v618_v43 = vld [vmem:[#allocation8 + $0x20] sm:$0xf0] }
  0x1e   :  { %v96_v7 = vsub.f32 1.0, %v95_v6  ;;  %429 = vmatpush.bf16.msra.mxu0 %v593_v46  ;;  %639 = vmatpush.bf16.msra.mxu3 %v593_v46  ;;  %v628_v6 = vld [vmem:[#allocation8 + $0x70] sm:$0xf0]  ;;  %v617_v44 = vld [vmem:[#allocation8 + $0x1c] sm:$0xf] }
  0x1f   :  { %v123_v30 = vsub.f32 1.0, %v122_v29  ;;  %448 = vmatpush.bf16.msra.mxu1 %v597_v50  ;;  %467 = vmatpush.bf16.msra.mxu2 %v601_v51  ;;  %v621_v29 = vld [vmem:[#allocation8 + $0x38] sm:$0xf0]  ;;  %v540_v47 = vld [vmem:[#allocation8 + $0x20] sm:$0xf]  ;;  %v533_v51 = vor.u32 %v618_v43, %v532_v39 }
  0x20   :  { %v97_v8 = vmul.f32 %v662_v5, %v96_v7  ;;  %v619_v48 = vld [vmem:[#allocation8 + $0x28] sm:$0xf0]  ;;  %v520_v52 = vld [vmem:[#allocation8] sm:$0xf]  ;;  %v614_v58 = vld [vmem:[#allocation8 + $0x4] sm:$0xf] }
  0x21   :  { %v124_v31 = vmul.f32 %v664_v28, %v123_v30  ;;  %v620_v30 = vld [vmem:[#allocation8 + $0x34] sm:$0xf]  ;;  %v615_v53 = vld [vmem:[#allocation8 + $0x8] sm:$0xf0] }
  0x22   :  { %v98_v9 = vadd.f32 %v662_v5, %v97_v8  ;;  %430 = vmatpush.bf16.msra.mxu0 %v581_v57  ;;  %640 = vmatpush.bf16.msra.mxu3 %v581_v57  ;;  %v556_v8 = vld [vmem:[#allocation8 + $0x48] sm:$0xf]  ;;  %v549_v41 = vor.u32 %v620_v30, %v546_v33  ;;  %v541_v57 = vor.u32 %v619_v48, %v540_v47 }
  0x23   :  { %v125_v35 = vadd.f32 %v664_v28, %v124_v31  ;;  %449 = vmatpush.bf16.msra.mxu1 %v585_v63 }
  0x24   :  { %v100_v10 = vsel %vm99_vm0, %v662_v5, %v98_v9  ;;  %v576_v5 = vld [vmem:[#allocation8 + $0x68] sm:$0xf] }
  0x25   :  { %v127_v45 = vsel %vm126_vm1, %v664_v28, %v125_v35  ;;  %v544_v28 = vld [vmem:[#allocation8 + $0x30] sm:$0xf]  ;;  %v622_v35 = vld [vmem:[#allocation8 + $0x40] sm:$0xf0] }
  0x26   :  { %v545_v38 = vor.u32 %v621_v29, %v544_v28  ;;  %v553_v42 = vor.u32 %v622_v35, %v552_v34 }
  0x88   :  { %v91_v11 = vpop.xlane.xlu1 %90  ;;  %v87_v12 = vpop.xlane.xlu0 %86 }
  0x89   :  { %v103_v13 = vmul.f32 %v100_v10, %v91_v11  ;;  %v101_v14 = vmul.f32 %v100_v10, %v87_v12  ;;  %v624_v11 = vld [vmem:[#allocation8 + $0x50] sm:$0xf0]  ;;  %v623_v12 = vld [vmem:[#allocation8 + $0x4c] sm:$0xf] }
  0x8b   :  { %v864_v15 = vsub.f32 %v82_v0, %v103_v13  ;;  %v866_v16 = vsub.f32 %v80_v1, %v101_v14  ;;  %v568_v0 = vld [vmem:[#allocation8 + $0x60] sm:$0xf]  ;;  %v627_v1 = vld [vmem:[#allocation8 + $0x68] sm:$0xf0]  ;;  %v558_v13 = vld [vmem:[#allocation8 + $0x54] sm:$0xf0] }
  0x8c   :  { %v569_v7 = vor.u32 %v627_v1, %v568_v0  ;;  %v564_v14 = vld [vmem:[#allocation8 + $0x50] sm:$0xf]  ;;  %v528_v1 = vld [vmem:[#allocation8 + $0x8] sm:$0xf] }
  0x8d   :  { %v111_v17 = vmul.f32 %v864_v15, %v864_v15  ;;  %v109_v18 = vmul.f32 %v866_v16, %v866_v16 }
  0x8e   :  { %431 = vmatpush.bf16.msra.mxu0 %v569_v7  ;;  %641 = vmatpush.bf16.msra.mxu3 %v569_v7 }
  0x8f   :  { %117 = vadd.xlane.f32.xlu0 %v111_v17  ;;  %113 = vadd.xlane.f32.xlu2 %v109_v18  ;;  %v625_v17 = vld [vmem:[#allocation8 + $0x58] sm:$0xf0] }
  0x90   :  { %v93_v19 = vpop.xlane.xlu1 %92  ;;  %v89_v20 = vpop.xlane.xlu0 %88  ;;  %v565_v27 = vor.u32 %v625_v17, %v564_v14 }
  0x91   :  { %v104_v21 = vmul.f32 %v100_v10, %v93_v19  ;;  %v102_v22 = vmul.f32 %v100_v10, %v89_v20  ;;  %v577_v10 = vor.u32 %v628_v6, %v576_v5  ;;  %v557_v20 = vor.u32 %v624_v11, %v556_v8 }
  0x92   :  { %v521_v5 = vor.u32 %v615_v53, %v520_v52 }
  0x93   :  { %v872_v23 = vsub.f32 %v83_v2, %v104_v21  ;;  %v874_v24 = vsub.f32 %v81_v3, %v102_v22  ;;  %v626_v2 = vld [vmem:[#allocation8 + $0x64] sm:$0xf]  ;;  %v589_v3 = vor.u32 %v631_v60, %v588_v59  ;;  %v561_v21 = vor.u32 %v623_v12, %v558_v13  ;;  %432 = vmatpush.bf16.msra.mxu0 %v557_v20  ;;  %v522_v59 = vld [vmem:[#allocation8 + $0xc] sm:$0xf0] }
  0x94   :  { %v573_v9 = vor.u32 %v626_v2, %v570_v4  ;;  %642 = vmatpush.bf16.msra.mxu3 %v557_v20  ;;  %v616_v2 = vld [vmem:[#allocation8 + $0x10] sm:$0xf0]  ;;  %v525_v8 = vor.u32 %v614_v58, %v522_v59 }
  0x95   :  { %v112_v25 = vmul.f32 %v872_v23, %v872_v23  ;;  %v110_v26 = vmul.f32 %v874_v24, %v874_v24  ;;  %468 = vmatpush.bf16.msra.mxu2 %v589_v3  ;;  %v529_v12 = vor.u32 %v616_v2, %v528_v1 }
  0x96   :  { %450 = vmatpush.bf16.msra.mxu1 %v573_v9 }
  0x97   :  { %119 = vadd.xlane.f32.xlu1 %v112_v25  ;;  %115 = vadd.xlane.f32.xlu2 %v110_v26 }
  0x98   :  { %433 = vmatpush.bf16.msra.mxu0 %v545_v38  ;;  %643 = vmatpush.bf16.msra.mxu3 %v545_v38 }
  0x99   :  { %469 = vmatpush.bf16.msra.mxu2 %v577_v10 }
  0x9a   :  { %451 = vmatpush.bf16.msra.mxu1 %v561_v21 }
  0x9c   :  { %434 = vmatpush.bf16.msra.mxu0 %v533_v51  ;;  %644 = vmatpush.bf16.msra.mxu3 %v533_v51 }
  0x9d   :  { %470 = vmatpush.bf16.msra.mxu2 %v565_v27 }
  0x9e   :  { %452 = vmatpush.bf16.msra.mxu1 %v549_v41 }
  0xa0   :  { %435 = vmatpush.bf16.msra.mxu0 %v521_v5  ;;  %645 = vmatpush.bf16.msra.mxu3 %v521_v5 }
  0xa1   :  { %471 = vmatpush.bf16.msra.mxu2 %v553_v42 }
  0xa5   :  { %472 = vmatpush.bf16.msra.mxu2 %v541_v57 }
  0xa9   :  { %473 = vmatpush.bf16.msra.mxu2 %v529_v12 }
 0x102   :  { %v114_v55 = vpop.xlane.xlu2 %113  ;;  %v118_v56 = vpop.xlane.xlu0 %117 }
 0x103   :  { %v880_v61 = vmul.f32 %v127_v45, %v114_v55  ;;  %v882_v62 = vmul.f32 %v127_v45, %v118_v56 }
 0x105   :  { %665 = vrsqrt.f32 %v880_v61  ;;  %vm146_vm2 = vcmp.eq.f32.partialorder %v880_v61, inf  ;;  %vm148_vm3 = vcmp.eq.f32.partialorder %v880_v61, 0.0  ;;  %v149_v9 = vand.u32 2147483648, %v880_v61 }
 0x106   :  { %667 = vrsqrt.f32 %v882_v62  ;;  %vm170_vm4 = vcmp.eq.f32.partialorder %v882_v62, inf  ;;  %v173_v14 = vand.u32 2147483648, %v882_v62  ;;  %vm172_vm5 = vcmp.eq.f32.partialorder %v882_v62, 0.0 }
 0x10a   :  { %v120_v18 = vpop.xlane.xlu1 %119  ;;  %v116_v19 = vpop.xlane.xlu2 %115 }
 0x10b   :  { %v666_v22 = vpop.eup %665  ;;  %v886_v25 = vmul.f32 %v127_v45, %v120_v18  ;;  %v888_v26 = vmul.f32 %v127_v45, %v116_v19  ;;  %v534_v45 = vld [vmem:[#allocation8 + $0x24] sm:$0xf0] }
 0x10c   :  { %v668_v31 = vpop.eup %667  ;;  %v140_v32 = vmul.f32 %v666_v22, %v880_v61  ;;  %v537_v56 = vor.u32 %v617_v44, %v534_v45 }
 0x10d   :  { %v164_v36 = vmul.f32 %v668_v31, %v882_v62  ;;  %669 = vrsqrt.f32 %v886_v25  ;;  %vm182_vm6 = vcmp.eq.f32.partialorder %v886_v25, inf  ;;  %vm184_vm7 = vcmp.eq.f32.partialorder %v886_v25, 0.0 }
 0x10e   :  { %v141_v37 = vmul.f32 %v666_v22, %v140_v32  ;;  %671 = vrsqrt.f32 %v888_v26  ;;  %453 = vmatpush.bf16.msra.mxu1 %v537_v56  ;;  %vm158_vm8 = vcmp.eq.f32.partialorder %v888_v26, inf  ;;  %v161_v34 = vand.u32 2147483648, %v888_v26 }
 0x10f   :  { %v165_v40 = vmul.f32 %v668_v31, %v164_v36  ;;  %vm160_vm9 = vcmp.eq.f32.partialorder %v888_v26, 0.0 }
 0x110   :  { %v142_v46 = vmul.f32 0.5, %v141_v37 }
 0x111   :  { %v166_v49 = vmul.f32 0.5, %v165_v40 }
 0x112   :  { %v143_v50 = vsub.f32 1.5, %v142_v46  ;;  %454 = vmatpush.bf16.msra.mxu1 %v525_v8  ;;  %v659_v46 = vld [vmem:[#allocation5] ss:$0 sm:$0xff] }
 0x113   :  { %v670_v54 = vpop.eup %669  ;;  %v167_v55 = vsub.f32 1.5, %v166_v49  ;;  %v135_v57 = vmul.f32 %v659_v46, %v866_v16 }
 0x114   :  { %v672_v60 = vpop.eup %671  ;;  %v144_v63 = vmul.f32 %v666_v22, %v143_v50  ;;  %v176_v0 = vmul.f32 %v670_v54, %v886_v25 }
 0x115   :  { %v168_v3 = vmul.f32 %v668_v31, %v167_v55  ;;  %v152_v4 = vmul.f32 %v672_v60, %v888_v26  ;;  %v137_v55 = vmul.f32 %v659_v46, %v864_v15 }
 0x116   :  { %v145_v6 = vmul.f32 %v144_v63, %v880_v61  ;;  %v177_v7 = vmul.f32 %v670_v54, %v176_v0 }
 0x117   :  { %v169_v10 = vmul.f32 %v168_v3, %v882_v62  ;;  %v153_v11 = vmul.f32 %v672_v60, %v152_v4 }
 0x118   :  { %v147_v13 = vsel %vm146_vm2, %v880_v61, %v145_v6  ;;  %v178_v17 = vmul.f32 0.5, %v177_v7  ;;  %v185_v61 = vand.u32 2147483648, %v886_v25 }
 0x119   :  { %v171_v18 = vsel %vm170_vm4, %v882_v62, %v169_v10  ;;  %v154_v19 = vmul.f32 0.5, %v153_v11  ;;  %v150_v20 = vsel %vm148_vm3, %v149_v9, %v147_v13  ;;  %v138_v11 = vmul.f32 %v659_v46, %v872_v23 }
 0x11a   :  { %v179_v21 = vsub.f32 1.5, %v178_v17  ;;  %v187_v22 = vadd.f32 1e-06, %v150_v20  ;;  %v174_v27 = vsel %vm172_vm5, %v173_v14, %v171_v18  ;;  %v136_v14 = vmul.f32 %v659_v46, %v874_v24  ;;  %v660_v20 = vld [vmem:[#allocation7] ss:$0 sm:$0xff] }
 0x11b   :  { %v155_v28 = vsub.f32 1.5, %v154_v19  ;;  %v189_v29 = vadd.f32 1e-06, %v174_v27 }
 0x11c   :  { %v180_v30 = vmul.f32 %v670_v54, %v179_v21  ;;  %673 = vrcp.f32 %v187_v22  ;;  %v200_v47 = vand.u32 2147483647, %v187_v22  ;;  %v202_v49 = vand.u32 2147483648, %v187_v22 }
 0x11d   :  { %v156_v31 = vmul.f32 %v672_v60, %v155_v28  ;;  %675 = vrcp.f32 %v189_v29  ;;  %v232_v53 = vand.u32 2147483648, %v189_v29  ;;  %vm226_vm12 = vweird.f32 %v189_v29 }
 0x11e   :  { %v181_v32 = vmul.f32 %v180_v30, %v886_v25  ;;  %vm196_vm13 = vweird.f32 %v187_v22  ;;  %vm925_vm14 = vcmp.eq.f32.partialorder %v200_v47, 8.507059e+37  ;;  %v203_v15 = vor.u32 1.1754944e-38, %v202_v49 }
 0x11f   :  { %v157_v62 = vmul.f32 %v156_v31, %v888_v26  ;;  %v233_v3 = vor.u32 1.1754944e-38, %v232_v53 }
 0x120   :  { %v183_v33 = vsel %vm182_vm6, %v886_v25, %v181_v32 }
 0x121   :  { %v159_v35 = vsel %vm158_vm8, %v888_v26, %v157_v62  ;;  %v186_v36 = vsel %vm184_vm7, %v185_v61, %v183_v33  ;;  %v230_v26 = vand.u32 2147483647, %v189_v29 }
 0x122   :  { %v674_v37 = vpop.eup %673  ;;  %v162_v38 = vsel %vm160_vm9, %v161_v34, %v159_v35  ;;  %v190_v39 = vadd.f32 1e-06, %v186_v36  ;;  %v292_v35 = vld [vmem:[%s960_s4] sm:$0x7]  ;;  %s819_s4 = smov [#allocation10]  }
 0x123   :  { %v676_v40 = vpop.eup %675  ;;  %v920_v41 = vadd.f32 1e-06, %v162_v38  ;;  %v192_v42 = vmul.f32 %v674_v37, %v187_v22  ;;  %vm197_vm11 = vweird.f32 %v674_v37  ;;  %vm231_vm1 = vcmp.eq.f32.partialorder %v230_v26, 8.507059e+37  ;;  %s501_s15 = sshll.u32 %s819_s4, 4  ;;  %s502_s15 = int_to_ptr.vmem [resolvable:$true] %s501_s15 }
 0x124   :  { %v222_v43 = vmul.f32 %v676_v40, %v189_v29  ;;  %677 = vrcp.f32 %v190_v39  ;;  %vm227_vm10 = vweird.f32 %v676_v40  ;;  %vm935_vm0 = vmor %vm196_vm13, %vm197_vm11  ;;  %v247_v4 = vand.u32 2147483648, %v190_v39 }
 0x125   :  { %v193_v44 = vsub.f32 1.0, %v192_v42  ;;  %679 = vrcp.f32 %v920_v41  ;;  %vm931_vm15 = vmor %vm226_vm12, %vm227_vm10  ;;  %v217_v5 = vand.u32 2147483648, %v920_v41  ;;  %v245_v7 = vand.u32 2147483647, %v190_v39 }
 0x126   :  { %v223_v25 = vsub.f32 1.0, %v222_v43  ;;  %v215_v9 = vand.u32 2147483647, %v920_v41  ;;  %vm241_vm4 = vweird.f32 %v190_v39  ;;  %vm211_vm5 = vweird.f32 %v920_v41 }
 0x127   :  { %v194_v45 = vmul.f32 %v674_v37, %v193_v44  ;;  %v248_v18 = vor.u32 1.1754944e-38, %v247_v4  ;;  %v218_v19 = vor.u32 1.1754944e-38, %v217_v5  ;;  %vm246_vm8 = vcmp.eq.f32.partialorder %v245_v7, 8.507059e+37 }
 0x128   :  { %v224_v48 = vmul.f32 %v676_v40, %v223_v25  ;;  %vm216_vm9 = vcmp.eq.f32.partialorder %v215_v9, 8.507059e+37  ;;  %v294_v36 = vperm.slane %v292_v35, 0  ;;  %v296_v42 = vperm.slane %v292_v35, 2 }
 0x129   :  { %v195_v51 = vadd.f32 %v674_v37, %v194_v45 }
 0x12a   :  { %v678_v50 = vpop.eup %677  ;;  %v225_v52 = vadd.f32 %v676_v40, %v224_v48 }
 0x12b   :  { %v680_v54 = vpop.eup %679  ;;  %v237_v56 = vmul.f32 %v678_v50, %v190_v39  ;;  %v199_v1 = vsel %vm935_vm0, %v674_v37, %v195_v51  ;;  %vm242_vm2 = vweird.f32 %v678_v50  ;;  %v295_v37 = vperm.slane %v292_v35, 1 }
 0x12c   :  { %v207_v59 = vmul.f32 %v680_v54, %v920_v41  ;;  %v229_v16 = vsel %vm931_vm15, %v676_v40, %v225_v52  ;;  %vm212_vm3 = vweird.f32 %v680_v54  ;;  %v204_v12 = vsel %vm925_vm14, %v203_v15, %v199_v1  ;;  %vm243_vm6 = vmor %vm241_vm4, %vm242_vm2 }
 0x12d   :  { %v238_v0 = vsub.f32 1.0, %v237_v56  ;;  %v234_v10 = vsel %vm231_vm1, %v233_v3, %v229_v16  ;;  %vm213_vm7 = vmor %vm211_vm5, %vm212_vm3  ;;  %v205_v27 = vmul.f32 %v204_v12, %v135_v57 }
 0x12e   :  { %v208_v2 = vsub.f32 1.0, %v207_v59  ;;  %v235_v21 = vmul.f32 %v234_v10, %v137_v55 }
 0x12f   :  { %v239_v6 = vmul.f32 %v678_v50, %v238_v0  ;;  %v254_v61 = vadd.f32 %v660_v20, %v205_v27 }
 0x130   :  { %v209_v8 = vmul.f32 %v680_v54, %v208_v2  ;;  %v256_v32 = vadd.f32 %v660_v20, %v235_v21 }
 0x131   :  { %v240_v13 = vadd.f32 %v678_v50, %v239_v6 }
 0x132   :  { %v210_v17 = vadd.f32 %v680_v54, %v209_v8 }
 0x133   :  { %v244_v22 = vsel %vm243_vm6, %v678_v50, %v240_v13 }
 0x134   :  { %v214_v23 = vsel %vm213_vm7, %v680_v54, %v210_v17  ;;  %v249_v28 = vsel %vm246_vm8, %v248_v18, %v244_v22 }
 0x135   :  { %v219_v29 = vsel %vm216_vm9, %v218_v19, %v214_v23  ;;  %v250_v30 = vmul.f32 %v249_v28, %v138_v11 }
 0x136   :  { %v220_v31 = vmul.f32 %v219_v29, %v136_v14 }
 0x137   :  { %v257_v24 = vadd.f32 %v660_v20, %v250_v30 }
 0x138   :  { %v255_v62 = vadd.f32 %v660_v20, %v220_v31 }
 0x139   :  { %v259_v33 = vpack.c.bf16 %v257_v24, %v256_v32 }
 0x13a   :  { %v258_v34 = vpack.c.bf16 %v255_v62, %v254_v61 }
 0x13b   :  { %441 = vmatmul.bf16.vlgmr.msra.gmra.mxu3 %v259_v33 }
 0x13c   :  { %436 = vmatmul.bf16.vlgmr.msra.gmra.mxu0 %v258_v34  ;;  %455 = vmatmul.bf16.vlgmr.msra.gmra.mxu1 %v258_v34 }
 0x13d   :  { %474 = vmatmul.bf16.vlgmr.msra.gmra.mxu2 %v258_v34 }
 0x14c   :  { %460 = vmatmul.bf16.gmra.mxu1 %v259_v33 }
 0x14d   :  { %479 = vmatmul.bf16.gmra.mxu2 %v259_v33 }
 0x1b9   :  { %v437_v38 = vpop.f32.mrf.mxu0  ;;  %v456_v39 = vpop.f32.mrf.mxu1 }
 0x1ba   :  { %v438_v40 = vadd.f32 %v437_v38, %v294_v36  ;;  %v457_v41 = vadd.f32 %v456_v39, %v295_v37 }
 0x1bc   :  { %485 = vst [vmem:[#allocation10] sm:$0xff] %v438_v40 }
 0x1bd   :  { %486 = vst [vmem:[#allocation10 + $0x8] sm:$0xff] %v457_v41 }
 0x1be   :  { %v442_v43 = vpop.f32.mrf.mxu3 }
 0x1bf   :  { %v443_v44 = vadd.f32 %v442_v43, %v294_v36 }
 0x1c0   :  { %v475_v25 = vpop.f32.mrf.mxu2 }
 0x1c1   :  { %491 = vst [vmem:[#allocation10 + $0x30] sm:$0xff] %v443_v44  ;;  %v476_v45 = vadd.f32 %v475_v25, %v296_v42  ;;  %v439_v46 = vpop.f32.mrf.mxu0  ;;  %v458_v47 = vpop.f32.mrf.mxu1 }
 0x1c2   :  { %v440_v48 = vadd.f32 %v439_v46, %v294_v36  ;;  %v459_v49 = vadd.f32 %v458_v47, %v295_v37 }
 0x1c3   :  { %487 = vst [vmem:[#allocation10 + $0x10] sm:$0xff] %v476_v45 }
 0x1c4   :  { %488 = vst [vmem:[#allocation10 + $0x18] sm:$0xff] %v440_v48 }
 0x1c5   :  { %489 = vst [vmem:[#allocation10 + $0x20] sm:$0xff] %v459_v49 }
 0x1c6   :  { %v444_v26 = vpop.f32.mrf.mxu3 }
 0x1c7   :  { %v445_v50 = vadd.f32 %v444_v26, %v294_v36 }
 0x1c8   :  { %v477_v51 = vpop.f32.mrf.mxu2 }
 0x1c9   :  { %494 = vst [vmem:[#allocation10 + $0x48] sm:$0xff] %v445_v50  ;;  %v478_v52 = vadd.f32 %v477_v51, %v296_v42  ;;  %v461_v53 = vpop.f32.mrf.mxu1 }
 0x1ca   :  { %v462_v54 = vadd.f32 %v461_v53, %v295_v37 }
 0x1cb   :  { %490 = vst [vmem:[#allocation10 + $0x28] sm:$0xff] %v478_v52 }
 0x1cc   :  { %492 = vst [vmem:[#allocation10 + $0x38] sm:$0xff] %v462_v54 }
 0x1d0   :  { %v480_v55 = vpop.f32.mrf.mxu2 }
 0x1d1   :  { %v481_v56 = vadd.f32 %v480_v55, %v296_v42  ;;  %v463_v57 = vpop.f32.mrf.mxu1 }
 0x1d2   :  { %v464_v58 = vadd.f32 %v463_v57, %v295_v37 }
 0x1d3   :  { %493 = vst [vmem:[#allocation10 + $0x40] sm:$0xff] %v481_v56 }
 0x1d4   :  { %495 = vst [vmem:[#allocation10 + $0x50] sm:$0xff] %v464_v58 }
 0x1d8   :  { %v482_v59 = vpop.f32.mrf.mxu2 }
 0x1d9   :  { %v483_v60 = vadd.f32 %v482_v59, %v296_v42 }
 0x1db   :  { %496 = vst [vmem:[#allocation10 + $0x58] sm:$0xff] %v483_v60 }
 0x1dc   :  { %509 = dma.vmem_to_hbm [thread:$0]  %s502_s15, 1536, %s504_s18, [#allocation4], %s820_s19, %s820_s19, %s821_s20  }
 0x1dd   :  { %807 = dma.done.wait [#allocation4], 1536  }
 0x1de   :  { %808 = vsyncadd [#allocation4], 4294965760 }
 0x1df   :  { %514 = vsyncpa [#allocation3], 1 }
 0x1e0   :  { %515 = vsyncpa [#allocation6], 1 }
 0x1e1   :  { %516 = vsyncpa [#allocation9], 1 }
 0x1e2   :  { %517 = vsyncpa [#allocation4], 1 }

</bundles_post_ra>
